<compile_context>
chip_gen: v7x
topology: tpu7x:2x2x1
jax: 0.10.0
libtpu: 0.0.40
codegen_flags: <defaults>
</compile_context>

<pallas_src>
import functools

import jax
import jax.numpy as jnp
from jax.experimental import pallas as pl
from jax.experimental.pallas import tpu as pltpu


# ----------------------------- Pallas kernels ------------------------------

def _deconv_matmul_kernel(a_ref, w_ref, b_ref, r_ref, o_ref):
    # Y = A @ W + bias_cols + residual  (f32 accumulation, f32 epilogue).
    acc = jnp.dot(a_ref[...], w_ref[...], preferred_element_type=jnp.float32)
    o_ref[...] = (acc + b_ref[...] + r_ref[...]).astype(o_ref.dtype)


def _pointwise_conv_sigmoid_kernel(w_ref, x_ref, b_ref, o_ref):
    # Y = sigmoid(W @ X + b); output is lane-dense (spatial on the lane axis).
    acc = jnp.dot(w_ref[...], x_ref[...], preferred_element_type=jnp.float32)
    o_ref[...] = jax.nn.sigmoid(acc + b_ref[...]).astype(o_ref.dtype)


# --------------------------- pallas_call wrappers ---------------------------

def deconv_matmul_fused_add(a, w_cols, bias_cols, resid, *,
                            tm_cap=256, compute_dtype=jnp.bfloat16):
    """(M,K) @ (K,Nc) + bias(1,Nc) + resid(M,Nc) -> (M,Nc) f32, tiled over rows.

    Implements ConvTranspose3d (kernel==stride) with the following residual
    add fused into the epilogue.
    """
    M, K = a.shape
    Kw, Nc = w_cols.shape
    assert K == Kw and resid.shape == (M, Nc) and bias_cols.shape == (1, Nc)
    # Fixed row tile (multiple of 16 for bf16 sublanes); ragged tails are
    # handled by Pallas boundary masking -- pipelining is never disabled.
    tm = M if M <= tm_cap else tm_cap
    grid = (pl.cdiv(M, tm),)

    return pl.pallas_call(
        _deconv_matmul_kernel,
        out_shape=jax.ShapeDtypeStruct((M, Nc), jnp.float32),
        grid=grid,
        in_specs=[
            pl.BlockSpec((tm, K), lambda i: (i, 0)),    # activations (bf16)
            pl.BlockSpec((K, Nc), lambda i: (0, 0)),    # tiny deconv weight, resident
            pl.BlockSpec((1, Nc), lambda i: (0, 0)),    # per-column bias (f32)
            pl.BlockSpec((tm, Nc), lambda i: (i, 0)),   # residual, fused add (f32)
        ],
        out_specs=pl.BlockSpec((tm, Nc), lambda i: (i, 0)),
        compiler_params=pltpu.CompilerParams(
            dimension_semantics=("parallel",),
        ),
    )(a.astype(compute_dtype), w_cols.astype(compute_dtype),
      bias_cols.astype(jnp.float32), resid.astype(jnp.float32))


def pointwise_conv_sigmoid(w, x, bias, *, tn_cap=2048, compute_dtype=jnp.bfloat16):
    """sigmoid(W(Cout,Cin) @ X(Cin,M) + b(Cout,1)) -> (Cout, M) f32.

    Lane-dense layout: the large N*S spatial axis sits on the 128-lane axis.
    """
    Cout, Cin = w.shape
    Cin2, Mtot = x.shape
    assert Cin == Cin2 and bias.shape == (Cout, 1)
    tn = Mtot if Mtot <= tn_cap else tn_cap      # lane tile (multiple of 128)
    grid = (pl.cdiv(Mtot, tn),)

    return pl.pallas_call(
        _pointwise_conv_sigmoid_kernel,
        out_shape=jax.ShapeDtypeStruct((Cout, Mtot), jnp.float32),
        grid=grid,
        in_specs=[
            pl.BlockSpec((Cout, Cin), lambda j: (0, 0)),
            pl.BlockSpec((Cin, tn), lambda j: (0, j)),
            pl.BlockSpec((Cout, 1), lambda j: (0, 0)),
        ],
        out_specs=pl.BlockSpec((Cout, tn), lambda j: (0, j)),
        compiler_params=pltpu.CompilerParams(
            dimension_semantics=("parallel",),
        ),
    )(w.astype(compute_dtype), x.astype(compute_dtype), bias.astype(jnp.float32))


# ------------------------------ parameters ---------------------------------

def init_params(inplanes, outplanes, key):
    """PyTorch-layout parameters for DecoderDeconv (uniform fan-in init)."""
    ks = jax.random.split(key, 6)

    def u(k, shape, bound):
        return jax.random.uniform(k, shape, jnp.float32, -bound, bound)

    b1 = 1.0 / (inplanes * 4 ** 3) ** 0.5
    b2 = 1.0 / (inplanes * 2 ** 3) ** 0.5
    b3 = 1.0 / (inplanes // 2) ** 0.5
    return dict(
        # ConvTranspose3d weight layout: (Cin, Cout, k, k, k)
        w1=u(ks[0], (inplanes, inplanes, 4, 4, 4), b1),
        b1=u(ks[1], (inplanes,), b1),
        w2=u(ks[2], (inplanes, inplanes // 2, 2, 2, 2), b2),
        b2=u(ks[3], (inplanes // 2,), b2),
        # Conv3d 1x1x1 weight with the trailing (1,1,1) kernel dims dropped
        w3=u(ks[4], (outplanes, inplanes // 2), b3),
        b3=u(ks[5], (outplanes,), b3),
    )


def prepare_params(p):
    """Build matmul-ready weight/bias layouts ONCE (no per-call transposes)."""
    ci1, co1, s1 = p["w1"].shape[0], p["w1"].shape[1], p["w1"].shape[2]
    ci2, co2, s2 = p["w2"].shape[0], p["w2"].shape[1], p["w2"].shape[2]
    return dict(
        w1m=p["w1"].reshape(ci1, co1 * s1 ** 3),
        b1m=jnp.repeat(p["b1"], s1 ** 3).reshape(1, co1 * s1 ** 3),
        w2m=p["w2"].reshape(ci2, co2 * s2 ** 3),
        b2m=jnp.repeat(p["b2"], s2 ** 3).reshape(1, co2 * s2 ** 3),
        w3m=p["w3"],                    # already (Cout, Cin) for lane-dense matmul
        b3m=p["b3"].reshape(-1, 1),
    )


# ------------------------------ model forward -------------------------------

def decoder_deconv_forward(x_low_1, x_low_2, pyramid, mp, *,
                           compute_dtype=jnp.bfloat16):
    N, C, D, H, W = pyramid.shape
    C2 = C // 2
    Cout = mp["w3m"].shape[0]
    D1, H1, W1 = 4 * D, 4 * H, 4 * W
    D2, H2, W2 = 8 * D, 8 * H, 8 * W

    # ---- upsample1: ConvTranspose3d(C, C, k=s=4), "+ x_low_2" fused ---------
    a1 = jnp.transpose(pyramid, (0, 2, 3, 4, 1)).reshape(N * D * H * W, C)
    r1 = jnp.transpose(
        x_low_2.reshape(N, C, D, 4, H, 4, W, 4), (0, 2, 4, 6, 1, 3, 5, 7)
    ).reshape(N * D * H * W, C * 64)
    y1 = deconv_matmul_fused_add(a1, mp["w1m"], mp["b1m"], r1,
                                 compute_dtype=compute_dtype)     # (N*S0, C*64)

    # space-to-depth unpack -> channels-last at the x4 resolution
    a2 = jnp.transpose(
        y1.reshape(N, D, H, W, C, 4, 4, 4), (0, 1, 5, 2, 6, 3, 7, 4)
    ).reshape(N * D1 * H1 * W1, C)

    # ---- upsample2: ConvTranspose3d(C, C//2, k=s=2), "+ x_low_1" fused ------
    r2 = jnp.transpose(
        x_low_1.reshape(N, C2, D1, 2, H1, 2, W1, 2), (0, 2, 4, 6, 1, 3, 5, 7)
    ).reshape(N * D1 * H1 * W1, C2 * 8)
    y2 = deconv_matmul_fused_add(a2, mp["w2m"], mp["b2m"], r2,
                                 compute_dtype=compute_dtype)     # (N*S1, C2*8)

    # ---- final 1x1x1 conv + sigmoid, lane-dense: X laid out as (C2, N*S2) ---
    x3 = jnp.transpose(
        y2.reshape(N, D1, H1, W1, C2, 2, 2, 2), (4, 0, 1, 5, 2, 6, 3, 7)
    ).reshape(C2, N * D2 * H2 * W2)
    y3 = pointwise_conv_sigmoid(mp["w3m"], x3, mp["b3m"],
                                compute_dtype=compute_dtype)      # (Cout, N*S2)

    return jnp.transpose(y3.reshape(Cout, N, D2, H2, W2), (1, 0, 2, 3, 4))


# ----------------------- pure-JAX reference (for checks) --------------------

def _reference_forward(x_low_1, x_low_2, pyramid, p):
    def deconv(x, w, b, s):
        n, ci, d, h, wd = x.shape
        co = w.shape[1]
        y = jnp.einsum("nidhw,ioabc->nodahbwc", x, w)
        y = y.reshape(n, co, d * s, h * s, wd * s)
        return y + b[None, :, None, None, None]

    y = deconv(pyramid, p["w1"], p["b1"], 4) + x_low_2
    y = deconv(y, p["w2"], p["b2"], 2) + x_low_1
    y = jnp.einsum("ncdhw,oc->nodhw", y, p["w3"]) + p["b3"][None, :, None, None, None]
    return jax.nn.sigmoid(y)


# ----------------------------------- main -----------------------------------

if __name__ == "__main__":
    inplanes, outplanes = 4, 2
    N, D, H, W = 2, 2, 2, 2

    key = jax.random.PRNGKey(0)
    k0, k1, k2, k3 = jax.random.split(key, 4)

    pyramid = jax.random.normal(k0, (N, inplanes, D, H, W), jnp.float32)
    x_low_2 = jax.random.normal(k1, (N, inplanes, 4 * D, 4 * H, 4 * W), jnp.float32)
    x_low_1 = jax.random.normal(k2, (N, inplanes // 2, 8 * D, 8 * H, 8 * W), jnp.float32)

    params = init_params(inplanes, outplanes, k3)
    mat_params = prepare_params(params)

    fwd = jax.jit(decoder_deconv_forward, static_argnames=("compute_dtype",))

    # Performance path (bf16 MXU operands, f32 accumulation/epilogue).
    out = jax.block_until_ready(fwd(x_low_1, x_low_2, pyramid, mat_params))
    # Full f32 path for a tight numerical check of the kernel math.
    out_f32 = jax.block_until_ready(
        fwd(x_low_1, x_low_2, pyramid, mat_params, compute_dtype=jnp.float32))

    ref = _reference_forward(x_low_1, x_low_2, pyramid, params)

    assert out.shape == (N, outplanes, 8 * D, 8 * H, 8 * W)
    assert bool(jnp.all(jnp.isfinite(out)))
    assert bool(jnp.all((out >= 0.0) & (out <= 1.0)))           # sigmoid range
    assert bool(jnp.allclose(out_f32, ref, atol=1e-5, rtol=1e-5)), \
        float(jnp.max(jnp.abs(out_f32 - ref)))
    assert bool(jnp.allclose(out, ref, atol=5e-2, rtol=0.0)), \
        float(jnp.max(jnp.abs(out - ref)))

    print("KERNEL_OK")
</pallas_src>

<mosaic_0001>
module attributes {stable_mosaic.version = 11 : i64} {
  func.func @_deconv_matmul_kernel(%arg0: i32, %arg1: memref<16x4xbf16, #tpu.memory_space<vmem>>, %arg2: memref<4x256xbf16, #tpu.memory_space<vmem>>, %arg3: memref<1x256xf32, #tpu.memory_space<vmem>>, %arg4: memref<16x256xf32, #tpu.memory_space<vmem>>, %arg5: memref<16x256xf32, #tpu.memory_space<vmem>>) attributes {dimension_semantics = [#tpu.dimension_semantics<parallel>], iteration_bounds = array<i64: 1>, scalar_prefetch = 0 : i64, scratch_operands = 0 : i64, tpu.core_type = #tpu.core_type<tc>, window_params = [{transform_indices = @transform_0, window_bounds = array<i64: 16, 4>}, {pipeline_mode = #tpu.pipeline_mode<synchronous>, transform_indices = @transform_1, window_bounds = array<i64: 4, 256>}, {pipeline_mode = #tpu.pipeline_mode<synchronous>, transform_indices = @transform_2, window_bounds = array<i64: 1, 256>}, {transform_indices = @transform_3, window_bounds = array<i64: 16, 256>}, {transform_indices = @transform_4, window_bounds = array<i64: 16, 256>}]} {
    %c0 = arith.constant 0 : index
    %c0_0 = arith.constant 0 : index
    %0 = vector.load %arg1[%c0, %c0_0] : memref<16x4xbf16, #tpu.memory_space<vmem>>, vector<16x4xbf16>
    %c0_1 = arith.constant 0 : index
    %c0_2 = arith.constant 0 : index
    %1 = vector.load %arg2[%c0_1, %c0_2] : memref<4x256xbf16, #tpu.memory_space<vmem>>, vector<4x256xbf16>
    %cst = arith.constant dense<0.000000e+00> : vector<16x256xf32>
    %2 = tpu.matmul %0, %1, %cst {dimension_numbers = #tpu.dot_dimension_numbers<[1], [0], [0], [1], [0, 0, 1, 1], [], []>} : vector<16x4xbf16>, vector<4x256xbf16>, vector<16x256xf32> -> vector<16x256xf32>
    %c0_3 = arith.constant 0 : index
    %c0_4 = arith.constant 0 : index
    %3 = vector.load %arg3[%c0_3, %c0_4] : memref<1x256xf32, #tpu.memory_space<vmem>>, vector<1x256xf32>
    %4 = vector.broadcast %3 : vector<1x256xf32> to vector<16x256xf32>
    %5 = arith.addf %2, %4 : vector<16x256xf32>
    %c0_5 = arith.constant 0 : index
    %c0_6 = arith.constant 0 : index
    %6 = vector.load %arg4[%c0_5, %c0_6] : memref<16x256xf32, #tpu.memory_space<vmem>>, vector<16x256xf32>
    %7 = arith.addf %5, %6 : vector<16x256xf32>
    %c0_7 = arith.constant 0 : index
    %c0_8 = arith.constant 0 : index
    %8 = vector.load %arg5[%c0_7, %c0_8] : memref<16x256xf32, #tpu.memory_space<vmem>>, vector<16x256xf32>
    tpu.vector_store %arg5[%c0_7, %c0_8], %7 {strides = array<i32>} : memref<16x256xf32, #tpu.memory_space<vmem>>, vector<16x256xf32>,
    return
  }
  func.func @transform_0(%arg0: i32) -> (i32, i32) {
    %c0_i32 = arith.constant 0 : i32
    %c0_i32_0 = arith.constant 0 : i32
    return %arg0, %c0_i32 : i32, i32
  }
  func.func @transform_1(%arg0: i32) -> (i32, i32) {
    %c0_i32 = arith.constant 0 : i32
    %c0_i32_0 = arith.constant 0 : i32
    %c0_i32_1 = arith.constant 0 : i32
    return %c0_i32, %c0_i32_0 : i32, i32
  }
  func.func @transform_2(%arg0: i32) -> (i32, i32) {
    %c0_i32 = arith.constant 0 : i32
    %c0_i32_0 = arith.constant 0 : i32
    %c0_i32_1 = arith.constant 0 : i32
    return %c0_i32, %c0_i32_0 : i32, i32
  }
  func.func @transform_3(%arg0: i32) -> (i32, i32) {
    %c0_i32 = arith.constant 0 : i32
    %c0_i32_0 = arith.constant 0 : i32
    return %arg0, %c0_i32 : i32, i32
  }
  func.func @transform_4(%arg0: i32) -> (i32, i32) {
    %c0_i32 = arith.constant 0 : i32
    %c0_i32_0 = arith.constant 0 : i32
    return %arg0, %c0_i32 : i32, i32
  }
}

module attributes {stable_mosaic.version = 11 : i64} {
  func.func @_deconv_matmul_kernel(%arg0: i32, %arg1: memref<256x4xbf16, #tpu.memory_space<vmem>>, %arg2: memref<4x16xbf16, #tpu.memory_space<vmem>>, %arg3: memref<1x16xf32, #tpu.memory_space<vmem>>, %arg4: memref<256x16xf32, #tpu.memory_space<vmem>>, %arg5: memref<256x16xf32, #tpu.memory_space<vmem>>) attributes {dimension_semantics = [#tpu.dimension_semantics<parallel>], iteration_bounds = array<i64: 4>, scalar_prefetch = 0 : i64, scratch_operands = 0 : i64, tpu.core_type = #tpu.core_type<tc>, window_params = [{transform_indices = @transform_0, window_bounds = array<i64: 256, 4>}, {pipeline_mode = #tpu.pipeline_mode<synchronous>, transform_indices = @transform_1, window_bounds = array<i64: 4, 16>}, {pipeline_mode = #tpu.pipeline_mode<synchronous>, transform_indices = @transform_2, window_bounds = array<i64: 1, 16>}, {transform_indices = @transform_3, window_bounds = array<i64: 256, 16>}, {transform_indices = @transform_4, window_bounds = array<i64: 256, 16>}]} {
    %c0 = arith.constant 0 : index
    %c0_0 = arith.constant 0 : index
    %0 = vector.load %arg1[%c0, %c0_0] : memref<256x4xbf16, #tpu.memory_space<vmem>>, vector<256x4xbf16>
    %c0_1 = arith.constant 0 : index
    %c0_2 = arith.constant 0 : index
    %1 = vector.load %arg2[%c0_1, %c0_2] : memref<4x16xbf16, #tpu.memory_space<vmem>>, vector<4x16xbf16>
    %cst = arith.constant dense<0.000000e+00> : vector<256x16xf32>
    %2 = tpu.matmul %0, %1, %cst {dimension_numbers = #tpu.dot_dimension_numbers<[1], [0], [0], [1], [0, 0, 1, 1], [], []>} : vector<256x4xbf16>, vector<4x16xbf16>, vector<256x16xf32> -> vector<256x16xf32>
    %c0_3 = arith.constant 0 : index
    %c0_4 = arith.constant 0 : index
    %3 = vector.load %arg3[%c0_3, %c0_4] : memref<1x16xf32, #tpu.memory_space<vmem>>, vector<1x16xf32>
    %4 = vector.broadcast %3 : vector<1x16xf32> to vector<256x16xf32>
    %5 = arith.addf %2, %4 : vector<256x16xf32>
    %c0_5 = arith.constant 0 : index
    %c0_6 = arith.constant 0 : index
    %6 = vector.load %arg4[%c0_5, %c0_6] : memref<256x16xf32, #tpu.memory_space<vmem>>, vector<256x16xf32>
    %7 = arith.addf %5, %6 : vector<256x16xf32>
    %c0_7 = arith.constant 0 : index
    %c0_8 = arith.constant 0 : index
    %8 = vector.load %arg5[%c0_7, %c0_8] : memref<256x16xf32, #tpu.memory_space<vmem>>, vector<256x16xf32>
    tpu.vector_store %arg5[%c0_7, %c0_8], %7 {strides = array<i32>} : memref<256x16xf32, #tpu.memory_space<vmem>>, vector<256x16xf32>,
    return
  }
  func.func @transform_0(%arg0: i32) -> (i32, i32) {
    %c0_i32 = arith.constant 0 : i32
    %c0_i32_0 = arith.constant 0 : i32
    return %arg0, %c0_i32 : i32, i32
  }
  func.func @transform_1(%arg0: i32) -> (i32, i32) {
    %c0_i32 = arith.constant 0 : i32
    %c0_i32_0 = arith.constant 0 : i32
    %c0_i32_1 = arith.constant 0 : i32
    return %c0_i32, %c0_i32_0 : i32, i32
  }
  func.func @transform_2(%arg0: i32) -> (i32, i32) {
    %c0_i32 = arith.constant 0 : i32
    %c0_i32_0 = arith.constant 0 : i32
    %c0_i32_1 = arith.constant 0 : i32
    return %c0_i32, %c0_i32_0 : i32, i32
  }
  func.func @transform_3(%arg0: i32) -> (i32, i32) {
    %c0_i32 = arith.constant 0 : i32
    %c0_i32_0 = arith.constant 0 : i32
    return %arg0, %c0_i32 : i32, i32
  }
  func.func @transform_4(%arg0: i32) -> (i32, i32) {
    %c0_i32 = arith.constant 0 : i32
    %c0_i32_0 = arith.constant 0 : i32
    return %arg0, %c0_i32 : i32, i32
  }
}

module attributes {stable_mosaic.version = 11 : i64} {
  func.func @_pointwise_conv_sigmoid_kernel(%arg0: i32, %arg1: memref<2x2xbf16, #tpu.memory_space<vmem>>, %arg2: memref<2x2048xbf16, #tpu.memory_space<vmem>>, %arg3: memref<2x1xf32, #tpu.memory_space<vmem>>, %arg4: memref<2x2048xf32, #tpu.memory_space<vmem>>) attributes {dimension_semantics = [#tpu.dimension_semantics<parallel>], iteration_bounds = array<i64: 4>, scalar_prefetch = 0 : i64, scratch_operands = 0 : i64, tpu.core_type = #tpu.core_type<tc>, window_params = [{pipeline_mode = #tpu.pipeline_mode<synchronous>, transform_indices = @transform_0, window_bounds = array<i64: 2, 2>}, {transform_indices = @transform_1, window_bounds = array<i64: 2, 2048>}, {pipeline_mode = #tpu.pipeline_mode<synchronous>, transform_indices = @transform_2, window_bounds = array<i64: 2, 1>}, {transform_indices = @transform_3, window_bounds = array<i64: 2, 2048>}]} {
    %c0 = arith.constant 0 : index
    %c0_0 = arith.constant 0 : index
    %0 = vector.load %arg1[%c0, %c0_0] : memref<2x2xbf16, #tpu.memory_space<vmem>>, vector<2x2xbf16>
    %c0_1 = arith.constant 0 : index
    %c0_2 = arith.constant 0 : index
    %1 = vector.load %arg2[%c0_1, %c0_2] : memref<2x2048xbf16, #tpu.memory_space<vmem>>, vector<2x2048xbf16>
    %cst = arith.constant dense<0.000000e+00> : vector<2x2048xf32>
    %2 = tpu.matmul %0, %1, %cst {dimension_numbers = #tpu.dot_dimension_numbers<[1], [0], [0], [1], [0, 0, 1, 1], [], []>} : vector<2x2xbf16>, vector<2x2048xbf16>, vector<2x2048xf32> -> vector<2x2048xf32>
    %c0_3 = arith.constant 0 : index
    %c0_4 = arith.constant 0 : index
    %3 = vector.load %arg3[%c0_3, %c0_4] : memref<2x1xf32, #tpu.memory_space<vmem>>, vector<2x1xf32>
    %4 = vector.broadcast %3 : vector<2x1xf32> to vector<2x2048xf32>
    %5 = arith.addf %2, %4 : vector<2x2048xf32>
    %6 = arith.negf %5 : vector<2x2048xf32>
    %7 = math.exp %6 : vector<2x2048xf32>
    %cst_5 = arith.constant 1.000000e+00 : f32
    %8 = vector.broadcast %cst_5 : f32 to vector<2x2048xf32>
    %9 = arith.addf %8, %7 : vector<2x2048xf32>
    %10 = arith.divf %8, %9 : vector<2x2048xf32>
    %c0_6 = arith.constant 0 : index
    %c0_7 = arith.constant 0 : index
    %11 = vector.load %arg4[%c0_6, %c0_7] : memref<2x2048xf32, #tpu.memory_space<vmem>>, vector<2x2048xf32>
    tpu.vector_store %arg4[%c0_6, %c0_7], %10 {strides = array<i32>} : memref<2x2048xf32, #tpu.memory_space<vmem>>, vector<2x2048xf32>,
    return
  }
  func.func @transform_0(%arg0: i32) -> (i32, i32) {
    %c0_i32 = arith.constant 0 : i32
    %c0_i32_0 = arith.constant 0 : i32
    %c0_i32_1 = arith.constant 0 : i32
    return %c0_i32, %c0_i32_0 : i32, i32
  }
  func.func @transform_1(%arg0: i32) -> (i32, i32) {
    %c0_i32 = arith.constant 0 : i32
    %c0_i32_0 = arith.constant 0 : i32
    return %c0_i32, %arg0 : i32, i32
  }
  func.func @transform_2(%arg0: i32) -> (i32, i32) {
    %c0_i32 = arith.constant 0 : i32
    %c0_i32_0 = arith.constant 0 : i32
    %c0_i32_1 = arith.constant 0 : i32
    return %c0_i32, %c0_i32_0 : i32, i32
  }
  func.func @transform_3(%arg0: i32) -> (i32, i32) {
    %c0_i32 = arith.constant 0 : i32
    %c0_i32_0 = arith.constant 0 : i32
    return %c0_i32, %arg0 : i32, i32
  }
}

</mosaic_0001>

<bundles_post_ra>
// kernel: decoder_deconv_forward.3
= control target key start
LH: loop header
LB: loop body
LE: loop exit
PB: predicated region body
PF: predicated region fallthrough
CT: control target
= control target key end

     0   :  { %vm51_vm0 = vcmask 1041408   ;;  %v123_v1 = vmov 0   ;;  %vm47_vm1 = vcmask 31744   ;;  %v23_v5 = vlaneseq  ;;  %s182_s1 = inlined_call_operand.vmem [shape: bf16[4,256], index: 1, kind: input, shape index: {}]   ;;  %s183_s0 = inlined_call_operand.vmem [shape: bf16[16,4], index: 0, kind: input, shape index: {}]   ;;  %s184_s2 = inlined_call_operand.vmem [shape: f32[1,256], index: 2, kind: input, shape index: {}]   ;;  %s185_s3 = inlined_call_operand.vmem [shape: f32[16,256], index: 3, kind: input, shape index: {}]   ;;  %s186_s4 = inlined_call_operand.vmem [shape: f32[16,256], index: 4, kind: output, shape index: {}]  }
   0x1   :  { %v118_v0 = vld.sshfl [vmem:[%s182_s1] sm:$0x33 pattern:$0x76325410]  ;;  %90 = vmatprep.mubr.bf16.mxu0 %v123_v1  ;;  %v102_v16 = vld [vmem:[%s185_s3 + $0x8] sm:$0xff]  ;;  %v103_v19 = vld [vmem:[%s185_s3 + $0x10] sm:$0xff] }
   0x2   :  { %v46_v2 = vcombine.high %v118_v0, %v118_v0  ;;  %v53_v3 = vsel %vm51_vm0, %v118_v0, 0  ;;  %v122_v4 = vld [vmem:[%s183_s0] sm:$0xff]   ;;  %v24_v6 = vshrl.u32 %v23_v5, 7  ;;  %v104_v23 = vld [vmem:[%s185_s3 + $0x18] sm:$0xff] }
   0x3   :  { %v21_v8 = vld [vmem:[%s184_s2] sm:$0x3] }
   0x4   :  { %119 = vmatprep.subr.msk.bf16.mxu0 %vm51_vm0, %v46_v2  ;;  %v25_v7 = vsub.s32 0, %v24_v6  ;;  %v29_v9 = vsub.s32 1, %v24_v6  ;;  %v101_v13 = vld [vmem:[%s185_s3] sm:$0xff] }
   0x5   :  { %59 = vmatpush1.bf16.msra.mxu0 %v53_v3 }
   0x6   :  { %v26_v10 = vrot.slane %v21_v8, %v25_v7  ;;  %v30_v11 = vrot.slane %v21_v8, %v29_v9 }
   0x8   :  { %120 = vmatmul.mubr.msk.bf16.vlgmr.msra.gmra.mrb[0].mxu0 %vm47_vm1, %v122_v4 }
  0xdb   :  { %v92_v12 = vpop.f32.mrb[0].mxu0 }
  0xdc   :  { %v93_v14 = vadd.f32 %v92_v12, %v26_v10  ;;  %v94_v15 = vpop.f32.mrb[1].mxu0 }
  0xdd   :  { %v95_v17 = vadd.f32 %v94_v15, %v30_v11  ;;  %v96_v18 = vpop.f32.mrb[2].mxu0 }
  0xde   :  { %v105_v20 = vadd.f32 %v101_v13, %v93_v14  ;;  %v97_v21 = vadd.f32 %v96_v18, %v26_v10  ;;  %v98_v22 = vpop.f32.mrb[3].mxu0 }
  0xdf   :  { %v106_v24 = vadd.f32 %v102_v16, %v95_v17  ;;  %v99_v25 = vadd.f32 %v98_v22, %v30_v11 }
  0xe0   :  { %109 = vst [vmem:[%s186_s4] sm:$0xff] %v105_v20  ;;  %v107_v26 = vadd.f32 %v103_v19, %v97_v21 }
  0xe1   :  { %110 = vst [vmem:[%s186_s4 + $0x8] sm:$0xff] %v106_v24  ;;  %v108_v27 = vadd.f32 %v104_v23, %v99_v25 }
  0xe2   :  { %111 = vst [vmem:[%s186_s4 + $0x10] sm:$0xff] %v107_v26 }
  0xe3   :  { %112 = vst [vmem:[%s186_s4 + $0x18] sm:$0xff] %v108_v27 }

// kernel: decoder_deconv_forward.4
= control target key start
LH: loop header
LB: loop body
LE: loop exit
PB: predicated region body
PF: predicated region fallthrough
CT: control target
= control target key end

     0   :  { %s881_s15 = smov 0   ;;  %s1079_s0 = inlined_call_operand.vmem [shape: bf16[1024,4], index: 0, kind: input, shape index: {}]   ;;  %s1080_s1 = inlined_call_operand.vmem [shape: bf16[4,16], index: 1, kind: input, shape index: {}]   ;;  %s1081_s2 = inlined_call_operand.vmem [shape: f32[1,16], index: 2, kind: input, shape index: {}]   ;;  %s1082_s3 = inlined_call_operand.vmem [shape: f32[1024,16], index: 3, kind: input, shape index: {}]   ;;  %s1083_s4 = inlined_call_operand.vmem [shape: f32[1024,16], index: 4, kind: output, shape index: {}]  }
   0x1 LB: > { %s723_s16 = sadd.s32 4294967295, %s854_s15   ;;  %p727_p0 = scmp.ge.s32.totalorder %s854_s15, 1  ;;  %s854_s15 = sphi %s881_s15, %s14_s15  }
   0x2   : > { %p174_p1 = scmp.lt.s32.totalorder %s854_s15, 5 }
   0x4   : > { %p175_p2 = pnand %p727_p0, %p174_p1 }
   0x5   : > { %v256_v0 = vld [vmem:[%s1080_s1] sm:$0x3] (!%p175_p2)  ;;  %vm393_vm0 = vcmask (!%p175_p2), 1041408   ;;  %s728_s19 = sshll.u32 (!%p175_p2), %s723_s16, 5  ;;  %vm344_vm1 = vcmask (!%p175_p2), 31744   ;;  %vm622_vm2 = vcmask (!%p175_p2), 130048  }
   0x6   : > { %178 = sbr.rel (%p175_p2) target bundleno = 263 (0x107), region = 36  ;;  %822 = vmatprep.subr.msk.bf16.mxu0 (!%p175_p2), %vm393_vm0, %v256_v0  ;;  %823 = vmatprep.subr.msk.bf16.mxu1 (!%p175_p2), %vm393_vm0, %v256_v0  ;;  %v395_v1 = vsel (!%p175_p2), %vm393_vm0, %v256_v0, 0  ;;  %p206_p3 = scmp.lt.s32.totalorder (!%p175_p2), %s728_s19, 127  ;;  %v941_v18 = vld [vmem:[%s1081_s2] ss:$0 sm:$0xff] (!%p175_p2) }
   0x7   : > { %787 = vmatpush3.bf16.msra.mxu0 (!%p175_p2), %v395_v1  ;;  %821 = vmatpush3.bf16.msra.mxu1 (!%p175_p2), %v395_v1 }
   0xd   : > { %s1085_s19 = smov (!%p206_p3, %s728_s19), 127 }
   0xe   : > { %s729_s20 = sshll.u32 %s1085_s19, 2  ;;  %s731_s24 = sshll.u32 %s1085_s19, 3 }
   0xf   : > { %s898_s23 = scalar_lea.vmem %s1079_s0, %s729_s20  ;;  %s936_s27 = scalar_lea.vmem %s1082_s3, %s731_s24 }
  0x10   : > { %v832_v2 = vld [vmem:[%s898_s23] sm:$0xff]   ;;  %v834_v4 = vld [vmem:[%s898_s23 + $0x8] sm:$0xff]   ;;  %v836_v6 = vld [vmem:[%s898_s23 + $0x10] sm:$0xff]   ;;  %s950_s6 = scalar_lea.vmem %s1083_s4, %s731_s24 }
  0x11   : > { %v833_v3 = vld [vmem:[%s898_s23 + $0x40] sm:$0xff]   ;;  %788 = vmatprep.mubr.msk.bf16.mxu0 %vm344_vm1, %v832_v2  ;;  %v835_v5 = vld [vmem:[%s898_s23 + $0x48] sm:$0xff]   ;;  %v837_v7 = vld [vmem:[%s898_s23 + $0x50] sm:$0xff]  }
  0x12   : > { %804 = vmatprep.mubr.msk.bf16.mxu1 %vm344_vm1, %v833_v3  ;;  %789 = vmatmul.mubr.msk.bf16.vlgmr.msra.gmra.mrb[0].mxu0 %vm344_vm1, %v834_v4  ;;  %v838_v8 = vld [vmem:[%s898_s23 + $0x18] sm:$0xff]   ;;  %v840_v10 = vld [vmem:[%s898_s23 + $0x20] sm:$0xff]   ;;  %v842_v12 = vld [vmem:[%s898_s23 + $0x28] sm:$0xff]  }
  0x13   : > { %805 = vmatmul.mubr.msk.bf16.vlgmr.msra.gmra.mrb[0].mxu1 %vm344_vm1, %v835_v5  ;;  %792 = vmatprep.mubr.msk.bf16.mxu0 %vm344_vm1, %v836_v6  ;;  %v839_v9 = vld [vmem:[%s898_s23 + $0x58] sm:$0xff]   ;;  %v841_v11 = vld [vmem:[%s898_s23 + $0x60] sm:$0xff]   ;;  %v843_v13 = vld [vmem:[%s898_s23 + $0x68] sm:$0xff]  }
  0x14   : > { %808 = vmatprep.mubr.msk.bf16.mxu1 %vm344_vm1, %v837_v7  ;;  %v844_v14 = vld [vmem:[%s898_s23 + $0x30] sm:$0xff]   ;;  %v846_v16 = vld [vmem:[%s898_s23 + $0x38] sm:$0xff]   ;;  %v558_v25 = vld [vmem:[%s936_s27] sm:$0xff] }
  0x15   : > { %v845_v15 = vld [vmem:[%s898_s23 + $0x70] sm:$0xff]   ;;  %v847_v17 = vld [vmem:[%s898_s23 + $0x78] sm:$0xff]   ;;  %v574_v29 = vld [vmem:[%s936_s27 + $0x80] sm:$0xff] }
  0x16   : > { %v560_v20 = vld [vmem:[%s936_s27 + $0x10] sm:$0xff]  ;;  %v561_v31 = vld [vmem:[%s936_s27 + $0x18] sm:$0xff]  ;;  %v559_v38 = vld [vmem:[%s936_s27 + $0x8] sm:$0xff] }
  0x17   : > { %v576_v23 = vld [vmem:[%s936_s27 + $0x90] sm:$0xff]  ;;  %v577_v36 = vld [vmem:[%s936_s27 + $0x98] sm:$0xff]  ;;  %v575_v44 = vld [vmem:[%s936_s27 + $0x88] sm:$0xff] }
  0x18   : > { %v564_v52 = vld [vmem:[%s936_s27 + $0x30] sm:$0xff]  ;;  %v562_v57 = vld [vmem:[%s936_s27 + $0x20] sm:$0xff]  ;;  %v565_v63 = vld [vmem:[%s936_s27 + $0x38] sm:$0xff] }
  0x19   : > { %v580_v55 = vld [vmem:[%s936_s27 + $0xb0] sm:$0xff]  ;;  %v578_v61 = vld [vmem:[%s936_s27 + $0xa0] sm:$0xff]  ;;  %v581_v4 = vld [vmem:[%s936_s27 + $0xb8] sm:$0xff] }
  0x1a   : > { %793 = vmatmul.mubr.msk.bf16.gmra.mrb[4].mxu0 %vm344_vm1, %v838_v8  ;;  %v563_v6 = vld [vmem:[%s936_s27 + $0x28] sm:$0xff] }
  0x1b   : > { %809 = vmatmul.mubr.msk.bf16.gmra.mrb[4].mxu1 %vm344_vm1, %v839_v9  ;;  %796 = vmatprep.mubr.msk.bf16.mxu0 %vm344_vm1, %v840_v10 }
  0x1c   : > { %812 = vmatprep.mubr.msk.bf16.mxu1 %vm344_vm1, %v841_v11 }
  0x22   : > { %797 = vmatmul.mubr.msk.bf16.gmra.mrb[8].mxu0 %vm344_vm1, %v842_v12  ;;  %v579_v12 = vld [vmem:[%s936_s27 + $0xa8] sm:$0xff] }
  0x23   : > { %813 = vmatmul.mubr.msk.bf16.gmra.mrb[8].mxu1 %vm344_vm1, %v843_v13  ;;  %800 = vmatprep.mubr.msk.bf16.mxu0 %vm344_vm1, %v844_v14 }
  0x24   : > { %816 = vmatprep.mubr.msk.bf16.mxu1 %vm344_vm1, %v845_v15 }
  0x2a   : > { %801 = vmatmul.mubr.msk.bf16.gmra.mrb[12].mxu0 %vm344_vm1, %v846_v16 }
  0x2b   : > { %817 = vmatmul.mubr.msk.bf16.gmra.mrb[12].mxu1 %vm344_vm1, %v847_v17 }
  0xe5   : > { %v790_v19 = vpop.f32.mrb[0].mxu0 }
  0xe6   : > { %v440_v21 = vadd.f32 %v790_v19, %v941_v18  ;;  %v806_v22 = vpop.f32.mrb[0].mxu1  ;;  %v431_v24 = vpop.f32.mrb[1].mxu0 }
  0xe7   : > { %v504_v26 = vadd.f32 %v806_v22, %v941_v18  ;;  %v432_v27 = vadd.f32 %v941_v18, %v431_v24  ;;  %v495_v28 = vpop.f32.mrb[1].mxu1  ;;  %v791_v30 = vpop.f32.mrb[2].mxu0  ;;  %v584_v24 = vld [vmem:[%s936_s27 + $0xd0] sm:$0xff] }
  0xe8   : > { %v592_v32 = vadd.f32 %v560_v20, %v440_v21  ;;  %v496_v33 = vadd.f32 %v941_v18, %v495_v28  ;;  %v443_v34 = vadd.f32 %v791_v30, %v941_v18  ;;  %v807_v35 = vpop.f32.mrb[2].mxu1  ;;  %v434_v37 = vpop.f32.mrb[3].mxu0  ;;  %v568_v21 = vld [vmem:[%s936_s27 + $0x50] sm:$0xff]  ;;  %v582_v30 = vld [vmem:[%s936_s27 + $0xc0] sm:$0xff] }
  0xe9   : > { %v608_v39 = vadd.f32 %v576_v23, %v504_v26  ;;  %v590_v40 = vadd.f32 %v558_v25, %v432_v27  ;;  %v507_v41 = vadd.f32 %v807_v35, %v941_v18  ;;  %v435_v42 = vadd.f32 %v941_v18, %v434_v37  ;;  %v498_v43 = vpop.f32.mrb[3].mxu1  ;;  %v566_v26 = vld [vmem:[%s936_s27 + $0x40] sm:$0xff]  ;;  %v585_v37 = vld [vmem:[%s936_s27 + $0xd8] sm:$0xff] }
  0xea   : > { %625 = vst.msk [vmem:[%s950_s6 + $0x10] sm:$0xff] %vm622_vm2, %v592_v32  ;;  %v606_v45 = vadd.f32 %v574_v29, %v496_v33  ;;  %v593_v46 = vadd.f32 %v561_v31, %v443_v34  ;;  %v499_v47 = vadd.f32 %v941_v18, %v498_v43  ;;  %v569_v32 = vld [vmem:[%s936_s27 + $0x58] sm:$0xff] }
  0xeb   : > { %641 = vst.msk [vmem:[%s950_s6 + $0x90] sm:$0xff] %vm622_vm2, %v608_v39  ;;  %623 = vst.msk [vmem:[%s950_s6] sm:$0xff] %vm622_vm2, %v590_v40  ;;  %v609_v48 = vadd.f32 %v577_v36, %v507_v41  ;;  %v591_v49 = vadd.f32 %v559_v38, %v435_v42  ;;  %v567_v39 = vld [vmem:[%s936_s27 + $0x48] sm:$0xff] }
  0xec   : > { %639 = vst.msk [vmem:[%s950_s6 + $0x80] sm:$0xff] %vm622_vm2, %v606_v45  ;;  %626 = vst.msk [vmem:[%s950_s6 + $0x18] sm:$0xff] %vm622_vm2, %v593_v46  ;;  %v607_v50 = vadd.f32 %v575_v44, %v499_v47  ;;  %v583_v45 = vld [vmem:[%s936_s27 + $0xc8] sm:$0xff] }
  0xed   : > { %642 = vst.msk [vmem:[%s950_s6 + $0x98] sm:$0xff] %vm622_vm2, %v609_v48  ;;  %624 = vst.msk [vmem:[%s950_s6 + $0x8] sm:$0xff] %vm622_vm2, %v591_v49  ;;  %v794_v51 = vpop.f32.mrb[4].mxu0 }
  0xee   : > { %640 = vst.msk [vmem:[%s950_s6 + $0x88] sm:$0xff] %vm622_vm2, %v607_v50  ;;  %v456_v53 = vadd.f32 %v794_v51, %v941_v18  ;;  %v810_v54 = vpop.f32.mrb[4].mxu1  ;;  %v447_v56 = vpop.f32.mrb[5].mxu0 }
  0xef   : > { %v520_v58 = vadd.f32 %v810_v54, %v941_v18  ;;  %v448_v59 = vadd.f32 %v941_v18, %v447_v56  ;;  %v511_v60 = vpop.f32.mrb[5].mxu1  ;;  %v795_v62 = vpop.f32.mrb[6].mxu0  ;;  %v588_v56 = vld [vmem:[%s936_s27 + $0xf0] sm:$0xff] }
  0xf0   : > { %v596_v0 = vadd.f32 %v564_v52, %v456_v53  ;;  %v512_v1 = vadd.f32 %v941_v18, %v511_v60  ;;  %v459_v2 = vadd.f32 %v795_v62, %v941_v18  ;;  %v811_v3 = vpop.f32.mrb[6].mxu1  ;;  %v450_v5 = vpop.f32.mrb[7].mxu0  ;;  %v572_v53 = vld [vmem:[%s936_s27 + $0x70] sm:$0xff]  ;;  %v586_v62 = vld [vmem:[%s936_s27 + $0xe0] sm:$0xff] }
  0xf1   : > { %v612_v7 = vadd.f32 %v580_v55, %v520_v58  ;;  %v594_v8 = vadd.f32 %v562_v57, %v448_v59  ;;  %v523_v9 = vadd.f32 %v811_v3, %v941_v18  ;;  %v451_v10 = vadd.f32 %v941_v18, %v450_v5  ;;  %v514_v11 = vpop.f32.mrb[7].mxu1  ;;  %v570_v58 = vld [vmem:[%s936_s27 + $0x60] sm:$0xff]  ;;  %v589_v5 = vld [vmem:[%s936_s27 + $0xf8] sm:$0xff] }
  0xf2   : > { %629 = vst.msk [vmem:[%s950_s6 + $0x30] sm:$0xff] %vm622_vm2, %v596_v0  ;;  %v610_v13 = vadd.f32 %v578_v61, %v512_v1  ;;  %v597_v14 = vadd.f32 %v565_v63, %v459_v2  ;;  %v515_v15 = vadd.f32 %v941_v18, %v514_v11  ;;  %v573_v0 = vld [vmem:[%s936_s27 + $0x78] sm:$0xff] }
  0xf3   : > { %645 = vst.msk [vmem:[%s950_s6 + $0xb0] sm:$0xff] %vm622_vm2, %v612_v7  ;;  %627 = vst.msk [vmem:[%s950_s6 + $0x20] sm:$0xff] %vm622_vm2, %v594_v8  ;;  %v613_v16 = vadd.f32 %v581_v4, %v523_v9  ;;  %v595_v17 = vadd.f32 %v563_v6, %v451_v10  ;;  %v571_v7 = vld [vmem:[%s936_s27 + $0x68] sm:$0xff] }
  0xf4   : > { %643 = vst.msk [vmem:[%s950_s6 + $0xa0] sm:$0xff] %vm622_vm2, %v610_v13  ;;  %630 = vst.msk [vmem:[%s950_s6 + $0x38] sm:$0xff] %vm622_vm2, %v597_v14  ;;  %v611_v19 = vadd.f32 %v579_v12, %v515_v15  ;;  %v587_v13 = vld [vmem:[%s936_s27 + $0xe8] sm:$0xff] }
  0xf5   : > { %646 = vst.msk [vmem:[%s950_s6 + $0xb8] sm:$0xff] %vm622_vm2, %v613_v16  ;;  %628 = vst.msk [vmem:[%s950_s6 + $0x28] sm:$0xff] %vm622_vm2, %v595_v17  ;;  %v798_v20 = vpop.f32.mrb[8].mxu0 }
  0xf6   : > { %644 = vst.msk [vmem:[%s950_s6 + $0xa8] sm:$0xff] %vm622_vm2, %v611_v19  ;;  %v472_v22 = vadd.f32 %v798_v20, %v941_v18  ;;  %v814_v23 = vpop.f32.mrb[8].mxu1  ;;  %v463_v25 = vpop.f32.mrb[9].mxu0 }
  0xf7   : > { %v536_v27 = vadd.f32 %v814_v23, %v941_v18  ;;  %v464_v28 = vadd.f32 %v941_v18, %v463_v25  ;;  %v527_v29 = vpop.f32.mrb[9].mxu1  ;;  %v799_v31 = vpop.f32.mrb[10].mxu0 }
  0xf8   : > { %v600_v33 = vadd.f32 %v568_v21, %v472_v22  ;;  %v528_v34 = vadd.f32 %v941_v18, %v527_v29  ;;  %v475_v35 = vadd.f32 %v799_v31, %v941_v18  ;;  %v815_v36 = vpop.f32.mrb[10].mxu1  ;;  %v466_v38 = vpop.f32.mrb[11].mxu0 }
  0xf9   : > { %v616_v40 = vadd.f32 %v584_v24, %v536_v27  ;;  %v598_v41 = vadd.f32 %v566_v26, %v464_v28  ;;  %v539_v42 = vadd.f32 %v815_v36, %v941_v18  ;;  %v467_v43 = vadd.f32 %v941_v18, %v466_v38  ;;  %v530_v44 = vpop.f32.mrb[11].mxu1 }
  0xfa   : > { %633 = vst.msk [vmem:[%s950_s6 + $0x50] sm:$0xff] %vm622_vm2, %v600_v33  ;;  %v614_v46 = vadd.f32 %v582_v30, %v528_v34  ;;  %v601_v47 = vadd.f32 %v569_v32, %v475_v35  ;;  %v531_v48 = vadd.f32 %v941_v18, %v530_v44 }
  0xfb   : > { %649 = vst.msk [vmem:[%s950_s6 + $0xd0] sm:$0xff] %vm622_vm2, %v616_v40  ;;  %631 = vst.msk [vmem:[%s950_s6 + $0x40] sm:$0xff] %vm622_vm2, %v598_v41  ;;  %v617_v49 = vadd.f32 %v585_v37, %v539_v42  ;;  %v599_v50 = vadd.f32 %v567_v39, %v467_v43 }
  0xfc   : > { %647 = vst.msk [vmem:[%s950_s6 + $0xc0] sm:$0xff] %vm622_vm2, %v614_v46  ;;  %634 = vst.msk [vmem:[%s950_s6 + $0x58] sm:$0xff] %vm622_vm2, %v601_v47  ;;  %v615_v51 = vadd.f32 %v583_v45, %v531_v48 }
  0xfd   : > { %650 = vst.msk [vmem:[%s950_s6 + $0xd8] sm:$0xff] %vm622_vm2, %v617_v49  ;;  %632 = vst.msk [vmem:[%s950_s6 + $0x48] sm:$0xff] %vm622_vm2, %v599_v50  ;;  %v802_v52 = vpop.f32.mrb[12].mxu0 }
  0xfe   : > { %648 = vst.msk [vmem:[%s950_s6 + $0xc8] sm:$0xff] %vm622_vm2, %v615_v51  ;;  %v488_v54 = vadd.f32 %v802_v52, %v941_v18  ;;  %v818_v55 = vpop.f32.mrb[12].mxu1  ;;  %v479_v57 = vpop.f32.mrb[13].mxu0 }
  0xff   : > { %v552_v59 = vadd.f32 %v818_v55, %v941_v18  ;;  %v480_v60 = vadd.f32 %v941_v18, %v479_v57  ;;  %v543_v61 = vpop.f32.mrb[13].mxu1  ;;  %v803_v63 = vpop.f32.mrb[14].mxu0 }
 0x100   : > { %v604_v1 = vadd.f32 %v572_v53, %v488_v54  ;;  %v544_v2 = vadd.f32 %v941_v18, %v543_v61  ;;  %v491_v3 = vadd.f32 %v803_v63, %v941_v18  ;;  %v819_v4 = vpop.f32.mrb[14].mxu1  ;;  %v482_v6 = vpop.f32.mrb[15].mxu0 }
 0x101   : > { %v620_v8 = vadd.f32 %v588_v56, %v552_v59  ;;  %v602_v9 = vadd.f32 %v570_v58, %v480_v60  ;;  %v555_v10 = vadd.f32 %v819_v4, %v941_v18  ;;  %v483_v11 = vadd.f32 %v941_v18, %v482_v6  ;;  %v546_v12 = vpop.f32.mrb[15].mxu1 }
 0x102   : > { %637 = vst.msk [vmem:[%s950_s6 + $0x70] sm:$0xff] %vm622_vm2, %v604_v1  ;;  %v618_v14 = vadd.f32 %v586_v62, %v544_v2  ;;  %v605_v15 = vadd.f32 %v573_v0, %v491_v3  ;;  %v547_v16 = vadd.f32 %v941_v18, %v546_v12 }
 0x103   : > { %653 = vst.msk [vmem:[%s950_s6 + $0xf0] sm:$0xff] %vm622_vm2, %v620_v8  ;;  %635 = vst.msk [vmem:[%s950_s6 + $0x60] sm:$0xff] %vm622_vm2, %v602_v9  ;;  %v621_v17 = vadd.f32 %v589_v5, %v555_v10  ;;  %v603_v19 = vadd.f32 %v571_v7, %v483_v11 }
 0x104   : > { %651 = vst.msk [vmem:[%s950_s6 + $0xe0] sm:$0xff] %vm622_vm2, %v618_v14  ;;  %638 = vst.msk [vmem:[%s950_s6 + $0x78] sm:$0xff] %vm622_vm2, %v605_v15  ;;  %v619_v20 = vadd.f32 %v587_v13, %v547_v16 }
 0x105   : > { %654 = vst.msk [vmem:[%s950_s6 + $0xf8] sm:$0xff] %vm622_vm2, %v621_v17  ;;  %636 = vst.msk [vmem:[%s950_s6 + $0x68] sm:$0xff] %vm622_vm2, %v603_v19 }
 0x106   : > { %652 = vst.msk [vmem:[%s950_s6 + $0xe8] sm:$0xff] %vm622_vm2, %v619_v20 }
 0x107 PF: > { %s14_s15 = sadd.s32 1, %s854_s15  }
 0x108   : > { %p11_p4 = scmp.ge.s32.totalorder %s14_s15, 6  }
 0x10a   :  { %13 = sbr.rel (!%p11_p4) target bundleno = 1 (0x1), region = 69 }

// kernel: decoder_deconv_forward.5
= control target key start
LH: loop header
LB: loop body
LE: loop exit
PB: predicated region body
PF: predicated region fallthrough
CT: control target
= control target key end

     0   :  { %s1054_s12 = smov 0   ;;  %s1152_s0 = inlined_call_operand.vmem [shape: bf16[2,2], index: 0, kind: input, shape index: {}]   ;;  %s1153_s1 = inlined_call_operand.vmem [shape: bf16[2,8192], index: 1, kind: input, shape index: {}]   ;;  %s1154_s2 = inlined_call_operand.vmem [shape: f32[2,1], index: 2, kind: input, shape index: {}]   ;;  %s1155_s3 = inlined_call_operand.vmem [shape: f32[2,8192], index: 3, kind: output, shape index: {}]  }
   0x1 LB: > { %s903_s13 = sadd.s32 4294967295, %s1029_s12   ;;  %p907_p0 = scmp.ge.s32.totalorder %s1029_s12, 1  ;;  %s1029_s12 = sphi %s1054_s12, %s13_s12  }
   0x2   : > { %p137_p1 = scmp.lt.s32.totalorder %s1029_s12, 5 }
   0x4   : > { %p138_p2 = pnand %p907_p0, %p137_p1 }
   0x5   : > { %s908_s14 = sshll.u32 (!%p138_p2), %s903_s13, 4  ;;  %v187_v0 = vlaneseq (!%p138_p2)  ;;  %v1031_v1 = vmov (!%p138_p2), 1966171168   ;;  %v1032_v3 = vmov (!%p138_p2), 0   ;;  %v175_v4 = vld [vmem:[%s1154_s2] sm:$0x3] (!%p138_p2) }
   0x6   : > { %141 = sbr.rel (%p138_p2) target bundleno = 301 (0x12d), region = 32  ;;  %p161_p3 = scmp.lt.s32.totalorder (!%p138_p2), %s908_s14, 63  ;;  %v185_v2 = vunpack.c.l.s4 (!%p138_p2), %v1031_v1  ;;  %366 = vmatprep.mubr.bf16.mxu0 (!%p138_p2), %v1032_v3  ;;  %407 = vmatprep.mubr.bf16.mxu1 (!%p138_p2), %v1032_v3  ;;  %vm285_vm0 = vcmask (!%p138_p2), 1040384   ;;  %v172_v28 = vld [vmem:[%s1152_s0] sm:$0x1] (!%p138_p2)  ;;  %vm281_vm1 = vcmask (!%p138_p2), 15360  }
   0x7   : > { %v1067_v5 = vshrl.u32 (!%p138_p2), %v187_v0, 7  ;;  %956 = vset.pattern.permute.xlu0 (!%p138_p2), %v1032_v3 }
   0x8   : > { %v186_v6 = vunpack.c.0.s8 (!%p138_p2), %v185_v2  ;;  %178 = vperm.xlu0 (!%p138_p2), %956, %v175_v4  }
   0xa   : > { %v189_v7 = vsub.s32 (!%p138_p2), %v186_v6, %v1067_v5 }
   0xd   : > { %s1157_s14 = smov (!%p161_p3, %s908_s14), 63 }
   0xe   : > { %s163_s19 = scalar_lea.vmem %s1153_s1, %s1157_s14  ;;  %s910_s22 = sshll.u32 %s1157_s14, 1 }
   0xf   : > { %v173_v8 = vld [vmem:[%s163_s19] sm:$0xff]  ;;  %v174_v9 = vld [vmem:[%s163_s19 + $0x8] sm:$0xff]  ;;  %s1137_s25 = scalar_lea.vmem %s1155_s3, %s910_s22 }
  0x10   : > { %v183_v10 = vcombine.high %v173_v8, %v173_v8  ;;  %v190_v11 = vrot.slane %v173_v8, %v189_v7  ;;  %v239_v12 = vrot.slane %v174_v9, %v189_v7  ;;  %v232_v13 = vcombine.high %v174_v9, %v174_v9 }
  0x12   : > { %v197_v14 = vrot.slane %v183_v10, %v189_v7  ;;  %v198_v15 = vcombine.high %v190_v11, %v190_v11  ;;  %v206_v16 = vrot.slane %v190_v11, %v189_v7  ;;  %v247_v17 = vcombine.high %v239_v12, %v239_v12 }
  0x13   : > { %v246_v23 = vrot.slane %v232_v13, %v189_v7  ;;  %v255_v34 = vrot.slane %v239_v12, %v189_v7 }
  0x14   : > { %v220_v18 = vrot.slane %v198_v15, %v189_v7  ;;  %v287_v19 = vsel %vm285_vm0, %v206_v16, 0  ;;  %v228_v20 = vcombine.high %v206_v16, %v206_v16  ;;  %v199_v21 = vcombine.high %v197_v14, %v197_v14 }
  0x15   : > { %v213_v22 = vrot.slane %v197_v14, %v189_v7  ;;  %v269_v27 = vrot.slane %v247_v17, %v189_v7  ;;  %v248_v35 = vcombine.high %v246_v23, %v246_v23  ;;  %v277_v36 = vcombine.high %v255_v34, %v255_v34 }
  0x16   : > { %911 = vmatprep.subr.msk.bf16.mxu0 %vm285_vm0, %v220_v18  ;;  %v230_v24 = vcombine.high %v220_v18, %v220_v18  ;;  %v293_v25 = vsel %vm285_vm0, %v228_v20, 0  ;;  %v227_v26 = vrot.slane %v199_v21, %v189_v7  ;;  %v311_v38 = vsel %vm285_vm0, %v255_v34, 0 }
  0x17   : > { %335 = vmatpush1.bf16.msra.mxu0 %v287_v19  ;;  %v229_v29 = vcombine.high %v213_v22, %v213_v22  ;;  %v299_v31 = vsel %vm285_vm0, %v213_v22, 0  ;;  %v279_v33 = vcombine.high %v269_v27, %v269_v27  ;;  %v276_v37 = vrot.slane %v248_v35, %v189_v7 }
  0x18   : > { %913 = vmatprep.subr.msk.bf16.mxu1 %vm285_vm0, %v230_v24  ;;  %915 = vmatprep.subr.msk.bf16.mxu0 %vm285_vm0, %v227_v26  ;;  %v231_v30 = vcombine.high %v227_v26, %v227_v26  ;;  %v317_v39 = vsel %vm285_vm0, %v277_v36, 0  ;;  %v262_v41 = vrot.slane %v246_v23, %v189_v7 }
  0x19   : > { %376 = vmatpush1.bf16.msra.mxu1 %v293_v25  ;;  %v305_v32 = vsel %vm285_vm0, %v229_v29, 0  ;;  %v280_v40 = vcombine.high %v276_v37, %v276_v37 }
  0x1a   : > { %912 = vmatmul.mubr.msk.bf16.vlgmr.msra.gmra.mrb[0].mxu0 %vm281_vm1, %v172_v28  ;;  %917 = vmatprep.subr.msk.bf16.mxu1 %vm285_vm0, %v231_v30  ;;  %v278_v42 = vcombine.high %v262_v41, %v262_v41  ;;  %v323_v43 = vsel %vm285_vm0, %v262_v41, 0 }
  0x1b   : > { %417 = vmatpush1.bf16.msra.mxu0 %v299_v31  ;;  %448 = vmatprep.mubr.bf16.mxu0 %v1032_v3 }
  0x1c   : > { %914 = vmatmul.mubr.msk.bf16.vlgmr.msra.gmra.mrb[0].mxu1 %vm281_vm1, %v172_v28  ;;  %919 = vmatprep.subr.msk.bf16.mxu0 %vm285_vm0, %v269_v27  ;;  %v329_v44 = vsel %vm285_vm0, %v278_v42, 0 }
  0x1d   : > { %458 = vmatpush1.bf16.msra.mxu1 %v305_v32  ;;  %489 = vmatprep.mubr.bf16.mxu1 %v1032_v3 }
  0x1e   : > { %921 = vmatprep.subr.msk.bf16.mxu1 %vm285_vm0, %v279_v33  ;;  %v1033_v33 = vmov 1983009808  }
  0x1f   : > { %v777_v34 = vunpack.c.l.s4 %v1033_v33 }
  0x22   : > { %916 = vmatmul.mubr.msk.bf16.vlgmr.msra.gmra.mrb[4].mxu0 %vm281_vm1, %v172_v28 }
  0x23   : > { %499 = vmatpush1.bf16.msra.mxu0 %v311_v38  ;;  %530 = vmatprep.mubr.bf16.mxu0 %v1032_v3 }
  0x24   : > { %918 = vmatmul.mubr.msk.bf16.vlgmr.msra.gmra.mrb[4].mxu1 %vm281_vm1, %v172_v28  ;;  %923 = vmatprep.subr.msk.bf16.mxu0 %vm285_vm0, %v276_v37 }
  0x25   : > { %540 = vmatpush1.bf16.msra.mxu1 %v317_v39  ;;  %571 = vmatprep.mubr.bf16.mxu1 %v1032_v3 }
  0x26   : > { %925 = vmatprep.subr.msk.bf16.mxu1 %vm285_vm0, %v280_v40 }
  0x2a   : > { %920 = vmatmul.mubr.msk.bf16.vlgmr.msra.gmra.mrb[8].mxu0 %vm281_vm1, %v172_v28 }
  0x2b   : > { %581 = vmatpush1.bf16.msra.mxu0 %v323_v43  ;;  %612 = vmatprep.mubr.bf16.mxu0 %v1032_v3  ;;  %v778_v43 = vunpack.c.0.s8 %v777_v34 }
  0x2c   : > { %922 = vmatmul.mubr.msk.bf16.vlgmr.msra.gmra.mrb[8].mxu1 %vm281_vm1, %v172_v28 }
  0x2d   : > { %622 = vmatpush1.bf16.msra.mxu1 %v329_v44  ;;  %653 = vmatprep.mubr.bf16.mxu1 %v1032_v3 }
  0x32   : > { %924 = vmatmul.mubr.msk.bf16.vlgmr.msra.gmra.mrb[12].mxu0 %vm281_vm1, %v172_v28 }
  0x34   : > { %926 = vmatmul.mubr.msk.bf16.vlgmr.msra.gmra.mrb[12].mxu1 %vm281_vm1, %v172_v28 }
  0x87   : > { %v1110_v45 = vpop.permute.xlu0 %178 }
  0xed   : > { %v368_v46 = vpop.f32.mrb[0].mxu0 }
  0xee   : > { %v370_v47 = vpop.f32.mrb[1].mxu0  ;;  %v369_v48 = vadd.f32 %v368_v46, %v1110_v45 }
  0xef   : > { %v372_v49 = vpop.f32.mrb[2].mxu0  ;;  %v409_v50 = vpop.f32.mrb[0].mxu1  ;;  %v371_v51 = vadd.f32 %v370_v47, %v1110_v45 }
  0xf0   : > { %v373_v52 = vpop.f32.mrb[3].mxu0  ;;  %v410_v53 = vadd.f32 %v409_v50, %v1110_v45  ;;  %v411_v54 = vpop.f32.mrb[1].mxu1  ;;  %v927_v55 = vmul.f32 -1.442695, %v369_v48 }
  0xf1   : > { %v412_v56 = vadd.f32 %v411_v54, %v1110_v45  ;;  %v928_v57 = vmul.f32 -1.442695, %v371_v51  ;;  %v413_v58 = vpop.f32.mrb[2].mxu1 }
  0xf2   : > { %959 = vpow2.f32 %v927_v55  ;;  %v929_v59 = vmul.f32 -1.442695, %v410_v53  ;;  %v414_v60 = vpop.f32.mrb[3].mxu1 }
  0xf3   : > { %961 = vpow2.f32 %v928_v57  ;;  %v930_v61 = vmul.f32 -1.442695, %v412_v56 }
  0xf4   : > { %963 = vpow2.f32 %v929_v59 }
  0xf5   : > { %965 = vpow2.f32 %v930_v61  ;;  %v450_v62 = vpop.f32.mrb[4].mxu0 }
  0xf6   : > { %v451_v63 = vadd.f32 %v450_v62, %v1110_v45  ;;  %v452_v0 = vpop.f32.mrb[5].mxu0  ;;  %v1128_v62 = vsub.s32 %v778_v43, %v1067_v5 }
  0xf7   : > { %v453_v1 = vadd.f32 %v452_v0, %v1110_v45  ;;  %v454_v2 = vpop.f32.mrb[6].mxu0  ;;  %v491_v3 = vpop.f32.mrb[4].mxu1 }
  0xf8   : > { %v931_v4 = vmul.f32 -1.442695, %v451_v63  ;;  %v492_v6 = vadd.f32 %v491_v3, %v1110_v45  ;;  %v455_v7 = vpop.f32.mrb[7].mxu0  ;;  %v493_v8 = vpop.f32.mrb[5].mxu1 }
  0xf9   : > { %v932_v9 = vmul.f32 -1.442695, %v453_v1  ;;  %v494_v10 = vadd.f32 %v493_v8, %v1110_v45  ;;  %v495_v11 = vpop.f32.mrb[6].mxu1 }
  0xfa   : > { %967 = vpow2.f32 %v931_v4  ;;  %v933_v12 = vmul.f32 -1.442695, %v492_v6  ;;  %v496_v13 = vpop.f32.mrb[7].mxu1 }
  0xfb   : > { %969 = vpow2.f32 %v932_v9  ;;  %v934_v14 = vmul.f32 -1.442695, %v494_v10 }
  0xfc   : > { %v960_v15 = vpop.eup %959  ;;  %971 = vpow2.f32 %v933_v12 }
  0xfd   : > { %v962_v16 = vpop.eup %961  ;;  %v710_v17 = vadd.f32 1.0, %v960_v15  ;;  %973 = vpow2.f32 %v934_v14  ;;  %v532_v18 = vpop.f32.mrb[8].mxu0 }
  0xfe   : > { %v964_v19 = vpop.eup %963  ;;  %v711_v20 = vadd.f32 1.0, %v962_v16  ;;  %v533_v21 = vadd.f32 %v532_v18, %v1110_v45  ;;  %v534_v22 = vpop.f32.mrb[9].mxu0 }
  0xff   : > { %v966_v23 = vpop.eup %965  ;;  %v712_v24 = vadd.f32 1.0, %v964_v19  ;;  %975 = vrcp.f32 %v710_v17  ;;  %v535_v25 = vadd.f32 %v534_v22, %v1110_v45  ;;  %v536_v26 = vpop.f32.mrb[10].mxu0 }
 0x100   : > { %v573_v27 = vpop.f32.mrb[8].mxu1  ;;  %v713_v28 = vadd.f32 1.0, %v966_v23  ;;  %977 = vrcp.f32 %v711_v20  ;;  %v935_v29 = vmul.f32 -1.442695, %v533_v21  ;;  %v537_v31 = vpop.f32.mrb[11].mxu0 }
 0x101   : > { %v574_v30 = vadd.f32 %v573_v27, %v1110_v45  ;;  %v575_v32 = vpop.f32.mrb[9].mxu1  ;;  %979 = vrcp.f32 %v712_v24  ;;  %v936_v35 = vmul.f32 -1.442695, %v535_v25 }
 0x102   : > { %v576_v36 = vadd.f32 %v575_v32, %v1110_v45  ;;  %v577_v37 = vpop.f32.mrb[10].mxu1  ;;  %981 = vrcp.f32 %v713_v28 }
 0x103   : > { %v937_v38 = vmul.f32 -1.442695, %v574_v30  ;;  %v578_v39 = vpop.f32.mrb[11].mxu1  ;;  %983 = vpow2.f32 %v935_v29 }
 0x104   : > { %v938_v40 = vmul.f32 -1.442695, %v576_v36  ;;  %v968_v41 = vpop.eup %967  ;;  %985 = vpow2.f32 %v936_v35 }
 0x105   : > { %v970_v42 = vpop.eup %969  ;;  %v714_v44 = vadd.f32 1.0, %v968_v41  ;;  %987 = vpow2.f32 %v937_v38  ;;  %v614_v46 = vpop.f32.mrb[12].mxu0 }
 0x106   : > { %v972_v47 = vpop.eup %971  ;;  %v715_v48 = vadd.f32 1.0, %v970_v42  ;;  %989 = vpow2.f32 %v938_v40  ;;  %v615_v49 = vadd.f32 %v614_v46, %v1110_v45  ;;  %v616_v50 = vpop.f32.mrb[13].mxu0 }
 0x107   : > { %v974_v51 = vpop.eup %973  ;;  %991 = vrcp.f32 %v714_v44  ;;  %v716_v52 = vadd.f32 1.0, %v972_v47  ;;  %v617_v53 = vadd.f32 %v616_v50, %v1110_v45  ;;  %v618_v54 = vpop.f32.mrb[14].mxu0 }
 0x108   : > { %v655_v55 = vpop.f32.mrb[12].mxu1  ;;  %993 = vrcp.f32 %v715_v48  ;;  %v717_v56 = vadd.f32 1.0, %v974_v51  ;;  %v939_v57 = vmul.f32 -1.442695, %v615_v49  ;;  %v619_v59 = vpop.f32.mrb[15].mxu0 }
 0x109   : > { %v656_v58 = vadd.f32 %v655_v55, %v1110_v45  ;;  %v657_v60 = vpop.f32.mrb[13].mxu1  ;;  %v976_v61 = vpop.eup %975  ;;  %995 = vrcp.f32 %v716_v52  ;;  %v940_v63 = vmul.f32 -1.442695, %v617_v53 }
 0x10a   : > { %v658_v0 = vadd.f32 %v657_v60, %v1110_v45  ;;  %v659_v1 = vpop.f32.mrb[14].mxu1  ;;  %v978_v2 = vpop.eup %977  ;;  %997 = vrcp.f32 %v717_v56 }
 0x10b   : > { %v941_v3 = vmul.f32 -1.442695, %v656_v58  ;;  %v660_v4 = vpop.f32.mrb[15].mxu1  ;;  %v980_v6 = vpop.eup %979  ;;  %v774_v7 = vcombine.low %v976_v61, %v978_v2  ;;  %999 = vpow2.f32 %v939_v57 }
 0x10c   : > { %v942_v8 = vmul.f32 -1.442695, %v658_v0  ;;  %v982_v9 = vpop.eup %981  ;;  %1001 = vpow2.f32 %v940_v63 }
 0x10d   : > { %v984_v10 = vpop.eup %983  ;;  %v775_v5 = vcombine.low %v980_v6, %v982_v9  ;;  %v782_v11 = vrot.slane %v774_v7, %v1128_v62  ;;  %1003 = vpow2.f32 %v941_v3 }
 0x10e   : > { %v986_v12 = vpop.eup %985  ;;  %v718_v13 = vadd.f32 1.0, %v984_v10  ;;  %1005 = vpow2.f32 %v942_v8 }
 0x10f   : > { %v988_v45 = vpop.eup %987  ;;  %v789_v14 = vrot.slane %v775_v5, %v1128_v62  ;;  %v719_v15 = vadd.f32 1.0, %v986_v12 }
 0x110   : > { %v990_v16 = vpop.eup %989  ;;  %1007 = vrcp.f32 %v718_v13  ;;  %v720_v17 = vadd.f32 1.0, %v988_v45 }
 0x111   : > { %v992_v18 = vpop.eup %991  ;;  %v790_v19 = vcombine.low %v782_v11, %v789_v14  ;;  %1009 = vrcp.f32 %v719_v15  ;;  %v721_v20 = vadd.f32 1.0, %v990_v16 }
 0x112   : > { %v994_v21 = vpop.eup %993  ;;  %1011 = vrcp.f32 %v720_v17 }
 0x113   : > { %v996_v22 = vpop.eup %995  ;;  %846 = vst [vmem:[%s1137_s25] sm:$0xff] %v790_v19  ;;  %v791_v23 = vcombine.low %v992_v18, %v994_v21  ;;  %1013 = vrcp.f32 %v721_v20 }
 0x114   : > { %v998_v24 = vpop.eup %997 }
 0x115   : > { %v1000_v25 = vpop.eup %999  ;;  %v799_v26 = vrot.slane %v791_v23, %v1128_v62  ;;  %v792_v27 = vcombine.low %v996_v22, %v998_v24 }
 0x116   : > { %v1002_v28 = vpop.eup %1001  ;;  %v722_v29 = vadd.f32 1.0, %v1000_v25 }
 0x117   : > { %v1004_v30 = vpop.eup %1003  ;;  %v806_v31 = vrot.slane %v792_v27, %v1128_v62  ;;  %v723_v32 = vadd.f32 1.0, %v1002_v28 }
 0x118   : > { %v1006_v33 = vpop.eup %1005  ;;  %1015 = vrcp.f32 %v722_v29  ;;  %v724_v34 = vadd.f32 1.0, %v1004_v30 }
 0x119   : > { %v807_v35 = vcombine.low %v799_v26, %v806_v31  ;;  %1017 = vrcp.f32 %v723_v32  ;;  %v725_v36 = vadd.f32 1.0, %v1006_v33 }
 0x11a   : > { %v1008_v37 = vpop.eup %1007  ;;  %1019 = vrcp.f32 %v724_v34 }
 0x11b   : > { %v1010_v38 = vpop.eup %1009  ;;  %847 = vst [vmem:[%s1137_s25 + $0x8] sm:$0xff] %v807_v35  ;;  %1021 = vrcp.f32 %v725_v36 }
 0x11c   : > { %v1012_v39 = vpop.eup %1011  ;;  %v808_v40 = vcombine.low %v1008_v37, %v1010_v38 }
 0x11d   : > { %v1014_v41 = vpop.eup %1013 }
 0x11e   : > { %v816_v42 = vrot.slane %v808_v40, %v1128_v62  ;;  %v809_v43 = vcombine.low %v1012_v39, %v1014_v41 }
 0x120   : > { %v823_v44 = vrot.slane %v809_v43, %v1128_v62 }
 0x122   : > { %v1016_v46 = vpop.eup %1015  ;;  %v824_v47 = vcombine.low %v816_v42, %v823_v44 }
 0x123   : > { %v1018_v48 = vpop.eup %1017 }
 0x124   : > { %v1020_v49 = vpop.eup %1019  ;;  %848 = vst [vmem:[%s1137_s25 + $0x10] sm:$0xff] %v824_v47  ;;  %v825_v50 = vcombine.low %v1016_v46, %v1018_v48 }
 0x125   : > { %v1022_v51 = vpop.eup %1021 }
 0x126   : > { %v833_v52 = vrot.slane %v825_v50, %v1128_v62  ;;  %v826_v53 = vcombine.low %v1020_v49, %v1022_v51 }
 0x128   : > { %v840_v54 = vrot.slane %v826_v53, %v1128_v62 }
 0x12a   : > { %v841_v55 = vcombine.low %v833_v52, %v840_v54 }
 0x12c   : > { %849 = vst [vmem:[%s1137_s25 + $0x18] sm:$0xff] %v841_v55 }
 0x12d PF: > { %s13_s12 = sadd.s32 1, %s1029_s12  }
 0x12e   : > { %p10_p4 = scmp.ge.s32.totalorder %s13_s12, 6  }
 0x130   :  { %12 = sbr.rel (!%p10_p4) target bundleno = 1 (0x1), region = 62 }

</bundles_post_ra>
